<compile_context>
chip_gen: v6e
topology: v6e:2x2x1
jax: 0.10.0
libtpu: 0.0.40
codegen_flags: <defaults>
</compile_context>

<pallas_src>
import jax
import jax.numpy as jnp
from jax.experimental import pallas as pl
from jax.experimental.pallas import tpu as pltpu

SELU_ALPHA = 1.6732632423543772
SELU_SCALE = 1.0507009873554805
BN_EPS = 1e-5


def _selu(x):
    return SELU_SCALE * jnp.where(x > 0, x, SELU_ALPHA * (jnp.exp(x) - 1.0))


# --------------------------------------------------------------------------
# Kernels
# --------------------------------------------------------------------------
def conv3x3_bn_selu_kernel(x_ref, w_ref, b_ref, o_ref):
    """3x3 conv (input pre-padded) + folded-BN bias + SELU; one batch element.

    x_ref : (1, H+2, W+2, Cin)   spatially padded NHWC input
    w_ref : (9, Cin, Cout)       3x3 weights (BN scale folded in)
    b_ref : (1, Cout)            folded BN bias
    o_ref : (1, H, W, Cout)
    """
    H, W, Cout = o_ref.shape[1], o_ref.shape[2], o_ref.shape[3]
    Cin = x_ref.shape[3]
    x = x_ref[0]                                              # (H+2, W+2, Cin)
    acc = jnp.zeros((H * W, Cout), jnp.float32)
    for dy in range(3):                                       # unrolled (9 taps)
        for dx in range(3):
            patch = x[dy:dy + H, dx:dx + W, :].reshape(H * W, Cin)
            acc = acc + jnp.dot(patch, w_ref[dy * 3 + dx],
                                preferred_element_type=jnp.float32)
    y = _selu(acc + b_ref[...])                               # (H*W, Cout)
    o_ref[0] = y.reshape(H, W, Cout).astype(o_ref.dtype)


def conv3x3_conv1x1_bn_selu_kernel(x_ref, w2_ref, b2_ref, w3_ref, b3_ref, o_ref):
    """Fused cv2 (3x3) + cv3 (1x1), both with folded BN + SELU.

    x_ref  : (1, H+2, W+2, Cmid)
    w2_ref : (9, Cmid, Cmid)
    b2_ref : (1, Cmid)
    w3_ref : (Cmid, Cout)
    b3_ref : (1, Cout)
    o_ref  : (1, H, W, Cout)
    """
    H, W, Cout = o_ref.shape[1], o_ref.shape[2], o_ref.shape[3]
    Cmid = x_ref.shape[3]
    x = x_ref[0]
    acc = jnp.zeros((H * W, Cmid), jnp.float32)
    for dy in range(3):
        for dx in range(3):
            patch = x[dy:dy + H, dx:dx + W, :].reshape(H * W, Cmid)
            acc = acc + jnp.dot(patch, w2_ref[dy * 3 + dx],
                                preferred_element_type=jnp.float32)
    y = _selu(acc + b2_ref[...])                              # cv2 output (H*W, Cmid)
    z = _selu(jnp.dot(y, w3_ref[...],
                      preferred_element_type=jnp.float32) + b3_ref[...])
    o_ref[0] = z.reshape(H, W, Cout).astype(o_ref.dtype)


# --------------------------------------------------------------------------
# pallas_call wrappers
# --------------------------------------------------------------------------
def _conv3x3_call(xp, w9, bias, cout):
    B, Hp, Wp, cin = xp.shape
    H, W = Hp - 2, Wp - 2
    flops = 2 * B * H * W * 9 * cin * cout
    bytes_accessed = 4 * (B * Hp * Wp * cin + 9 * cin * cout + cout
                          + B * H * W * cout)
    return pl.pallas_call(
        conv3x3_bn_selu_kernel,
        out_shape=jax.ShapeDtypeStruct((B, H, W, cout), jnp.float32),
        grid_spec=pltpu.PrefetchScalarGridSpec(
            num_scalar_prefetch=0,
            grid=(B,),
            in_specs=[
                pl.BlockSpec((1, Hp, Wp, cin), lambda b_: (b_, 0, 0, 0)),
                pl.BlockSpec((9, cin, cout), lambda b_: (0, 0, 0)),
                pl.BlockSpec((1, cout), lambda b_: (0, 0)),
            ],
            out_specs=pl.BlockSpec((1, H, W, cout), lambda b_: (b_, 0, 0, 0)),
        ),
        compiler_params=pltpu.CompilerParams(dimension_semantics=("parallel",)),
        cost_estimate=pl.CostEstimate(flops=flops,
                                      transcendentals=B * H * W * cout,
                                      bytes_accessed=bytes_accessed),
    )(xp, w9, bias)


def _conv3x3_conv1x1_call(xp, w2, b2, w3, b3):
    B, Hp, Wp, cmid = xp.shape
    H, W = Hp - 2, Wp - 2
    cout = w3.shape[-1]
    flops = 2 * B * H * W * (9 * cmid * cmid + cmid * cout)
    bytes_accessed = 4 * (B * Hp * Wp * cmid + 9 * cmid * cmid + cmid
                          + cmid * cout + cout + B * H * W * cout)
    return pl.pallas_call(
        conv3x3_conv1x1_bn_selu_kernel,
        out_shape=jax.ShapeDtypeStruct((B, H, W, cout), jnp.float32),
        grid_spec=pltpu.PrefetchScalarGridSpec(
            num_scalar_prefetch=0,
            grid=(B,),
            in_specs=[
                pl.BlockSpec((1, Hp, Wp, cmid), lambda b_: (b_, 0, 0, 0)),
                pl.BlockSpec((9, cmid, cmid), lambda b_: (0, 0, 0)),
                pl.BlockSpec((1, cmid), lambda b_: (0, 0)),
                pl.BlockSpec((cmid, cout), lambda b_: (0, 0)),
                pl.BlockSpec((1, cout), lambda b_: (0, 0)),
            ],
            out_specs=pl.BlockSpec((1, H, W, cout), lambda b_: (b_, 0, 0, 0)),
        ),
        compiler_params=pltpu.CompilerParams(dimension_semantics=("parallel",)),
        cost_estimate=pl.CostEstimate(
            flops=flops,
            transcendentals=B * H * W * (cmid + cout),
            bytes_accessed=bytes_accessed),
    )(xp, w2, b2, w3, b3)


# --------------------------------------------------------------------------
# Parameter folding + full Proto forward
# --------------------------------------------------------------------------
def fold_bn(w_oihw, gamma, beta, mean, var, eps=BN_EPS):
    """Fold eval-mode BatchNorm into conv weights (OIHW) + bias.

    Returns (weights as (kh*kw, Cin, Cout), bias as (1, Cout)).
    """
    s = gamma / jnp.sqrt(var + eps)                       # (Cout,)
    w = w_oihw * s[:, None, None, None]
    bias = beta - mean * s
    co, ci, kh, kw = w.shape
    w_kkio = jnp.transpose(w, (2, 3, 1, 0)).reshape(kh * kw, ci, co)
    return w_kkio, bias[None, :]


def proto_pallas(x_nchw, p):
    """Proto forward: x (B, c1, H, W) NCHW -> (B, c2, 2H, 2W) NCHW."""
    x = jnp.transpose(x_nchw, (0, 2, 3, 1))                       # -> NHWC (once)

    w1, b1 = fold_bn(p["w1"], p["g1"], p["be1"], p["m1"], p["v1"])
    w2, b2 = fold_bn(p["w2"], p["g2"], p["be2"], p["m2"], p["v2"])
    w3, b3 = fold_bn(p["w3"], p["g3"], p["be3"], p["m3"], p["v3"])
    w3 = w3[0]                                                    # (c_, c2) 1x1

    # cv1: 3x3 conv + BN + SELU
    xp = jnp.pad(x, ((0, 0), (1, 1), (1, 1), (0, 0)))
    y1 = _conv3x3_call(xp, w1, b1, w1.shape[-1])

    # nearest-neighbour 2x upsample (out[i, j] = in[i // 2, j // 2])
    y1u = jnp.repeat(jnp.repeat(y1, 2, axis=1), 2, axis=2)
    y1up = jnp.pad(y1u, ((0, 0), (1, 1), (1, 1), (0, 0)))

    # cv2 (3x3) + cv3 (1x1), fused into one kernel
    y = _conv3x3_conv1x1_call(y1up, w2, b2, w3, b3)

    return jnp.transpose(y, (0, 3, 1, 2))                         # -> NCHW (once)


# --------------------------------------------------------------------------
# Pure-JAX reference (NCHW, PyTorch conventions)
# --------------------------------------------------------------------------
def _conv_bn_selu_ref(x, w, gamma, beta, mean, var, pad):
    y = jax.lax.conv_general_dilated(
        x, w, window_strides=(1, 1), padding=((pad, pad), (pad, pad)),
        dimension_numbers=("NCHW", "OIHW", "NCHW"),
        precision=jax.lax.Precision.HIGHEST)
    s = gamma / jnp.sqrt(var + BN_EPS)
    y = y * s[None, :, None, None] + (beta - mean * s)[None, :, None, None]
    return SELU_SCALE * jnp.where(y > 0, y, SELU_ALPHA * (jnp.exp(y) - 1.0))


def proto_reference(x, p):
    y = _conv_bn_selu_ref(x, p["w1"], p["g1"], p["be1"], p["m1"], p["v1"], pad=1)
    y = jnp.repeat(jnp.repeat(y, 2, axis=2), 2, axis=3)           # nearest 2x
    y = _conv_bn_selu_ref(y, p["w2"], p["g2"], p["be2"], p["m2"], p["v2"], pad=1)
    y = _conv_bn_selu_ref(y, p["w3"], p["g3"], p["be3"], p["m3"], p["v3"], pad=0)
    return y


# --------------------------------------------------------------------------
if __name__ == "__main__":
    key = jax.random.PRNGKey(0)
    keys = jax.random.split(key, 16)

    # small shapes consistent with Proto(c1, c_, c2)
    B, C1, C_, C2, H, W = 2, 16, 64, 32, 8, 8

    x = jax.random.normal(keys[0], (B, C1, H, W), dtype=jnp.float32)

    def bn_params(kg, kb, km, kv, c):
        gamma = 1.0 + 0.1 * jax.random.normal(kg, (c,), jnp.float32)
        beta = 0.1 * jax.random.normal(kb, (c,), jnp.float32)
        mean = 0.1 * jax.random.normal(km, (c,), jnp.float32)
        var = jnp.abs(jax.random.normal(kv, (c,), jnp.float32)) + 0.5
        return gamma, beta, mean, var

    p = {}
    p["w1"] = 0.1 * jax.random.normal(keys[1], (C_, C1, 3, 3), jnp.float32)
    p["g1"], p["be1"], p["m1"], p["v1"] = bn_params(keys[2], keys[3], keys[4], keys[5], C_)
    p["w2"] = 0.1 * jax.random.normal(keys[6], (C_, C_, 3, 3), jnp.float32)
    p["g2"], p["be2"], p["m2"], p["v2"] = bn_params(keys[7], keys[8], keys[9], keys[10], C_)
    p["w3"] = 0.1 * jax.random.normal(keys[11], (C2, C_, 1, 1), jnp.float32)
    p["g3"], p["be3"], p["m3"], p["v3"] = bn_params(keys[12], keys[13], keys[14], keys[15], C2)

    out = jax.block_until_ready(proto_pallas(x, p))
    ref = jax.block_until_ready(proto_reference(x, p))

    assert out.shape == (B, C2, 2 * H, 2 * W), out.shape
    max_err = float(jnp.max(jnp.abs(out - ref)))
    assert jnp.allclose(out, ref, atol=2e-3, rtol=2e-3), f"mismatch, max_err={max_err}"

    print("KERNEL_OK")
</pallas_src>

<mosaic_0001>
module attributes {stable_mosaic.version = 11 : i64} {
  func.func @conv3x3_bn_selu_kernel(%arg0: i32, %arg1: memref<1x10x10x16xf32, #tpu.memory_space<vmem>>, %arg2: memref<9x16x64xf32, #tpu.memory_space<vmem>>, %arg3: memref<1x64xf32, #tpu.memory_space<vmem>>, %arg4: memref<1x8x8x64xf32, #tpu.memory_space<vmem>>) attributes {dimension_semantics = [#tpu.dimension_semantics<parallel>], iteration_bounds = array<i64: 2>, scalar_prefetch = 0 : i64, scratch_operands = 0 : i64, tpu.core_type = #tpu.core_type<tc>, window_params = [{transform_indices = @transform_0, window_bounds = array<i64: 1, 10, 10, 16>}, {pipeline_mode = #tpu.pipeline_mode<synchronous>, transform_indices = @transform_1, window_bounds = array<i64: 9, 16, 64>}, {pipeline_mode = #tpu.pipeline_mode<synchronous>, transform_indices = @transform_2, window_bounds = array<i64: 1, 64>}, {transform_indices = @transform_3, window_bounds = array<i64: 1, 8, 8, 64>}]} {
    %c0 = arith.constant 0 : index
    %c0_0 = arith.constant 0 : index
    %c0_1 = arith.constant 0 : index
    %c0_2 = arith.constant 0 : index
    %0 = vector.load %arg1[%c0, %c0_0, %c0_1, %c0_2] : memref<1x10x10x16xf32, #tpu.memory_space<vmem>>, vector<1x10x10x16xf32>
    %1 = vector.shape_cast %0 : vector<1x10x10x16xf32> to vector<10x10x16xf32>
    %cst = arith.constant 0.000000e+00 : f32
    %2 = vector.broadcast %cst : f32 to vector<64x64xf32>
    %3 = vector.extract_strided_slice %1 {offsets = [0, 0, 0], sizes = [8, 8, 16], strides = [1, 1, 1]} : vector<10x10x16xf32> to vector<8x8x16xf32>
    %4 = vector.shape_cast %3 : vector<8x8x16xf32> to vector<64x16xf32>
    %c0_3 = arith.constant 0 : index
    %c0_4 = arith.constant 0 : index
    %c0_5 = arith.constant 0 : index
    %5 = vector.load %arg2[%c0_3, %c0_4, %c0_5] : memref<9x16x64xf32, #tpu.memory_space<vmem>>, vector<1x16x64xf32>
    %6 = vector.shape_cast %5 : vector<1x16x64xf32> to vector<16x64xf32>
    %cst_6 = arith.constant dense<0.000000e+00> : vector<64x64xf32>
    %7 = tpu.matmul %4, %6, %cst_6 {dimension_numbers = #tpu.dot_dimension_numbers<[1], [0], [0], [1], [0, 0, 1, 1], [], []>} : vector<64x16xf32>, vector<16x64xf32>, vector<64x64xf32> -> vector<64x64xf32>
    %8 = arith.addf %2, %7 : vector<64x64xf32>
    %9 = vector.extract_strided_slice %1 {offsets = [0, 1, 0], sizes = [8, 8, 16], strides = [1, 1, 1]} : vector<10x10x16xf32> to vector<8x8x16xf32>
    %10 = vector.shape_cast %9 : vector<8x8x16xf32> to vector<64x16xf32>
    %c1 = arith.constant 1 : index
    %c0_7 = arith.constant 0 : index
    %c0_8 = arith.constant 0 : index
    %11 = vector.load %arg2[%c1, %c0_7, %c0_8] : memref<9x16x64xf32, #tpu.memory_space<vmem>>, vector<1x16x64xf32>
    %12 = vector.shape_cast %11 : vector<1x16x64xf32> to vector<16x64xf32>
    %cst_9 = arith.constant dense<0.000000e+00> : vector<64x64xf32>
    %13 = tpu.matmul %10, %12, %cst_9 {dimension_numbers = #tpu.dot_dimension_numbers<[1], [0], [0], [1], [0, 0, 1, 1], [], []>} : vector<64x16xf32>, vector<16x64xf32>, vector<64x64xf32> -> vector<64x64xf32>
    %14 = arith.addf %8, %13 : vector<64x64xf32>
    %15 = vector.extract_strided_slice %1 {offsets = [0, 2, 0], sizes = [8, 8, 16], strides = [1, 1, 1]} : vector<10x10x16xf32> to vector<8x8x16xf32>
    %16 = vector.shape_cast %15 : vector<8x8x16xf32> to vector<64x16xf32>
    %c2 = arith.constant 2 : index
    %c0_10 = arith.constant 0 : index
    %c0_11 = arith.constant 0 : index
    %17 = vector.load %arg2[%c2, %c0_10, %c0_11] : memref<9x16x64xf32, #tpu.memory_space<vmem>>, vector<1x16x64xf32>
    %18 = vector.shape_cast %17 : vector<1x16x64xf32> to vector<16x64xf32>
    %cst_12 = arith.constant dense<0.000000e+00> : vector<64x64xf32>
    %19 = tpu.matmul %16, %18, %cst_12 {dimension_numbers = #tpu.dot_dimension_numbers<[1], [0], [0], [1], [0, 0, 1, 1], [], []>} : vector<64x16xf32>, vector<16x64xf32>, vector<64x64xf32> -> vector<64x64xf32>
    %20 = arith.addf %14, %19 : vector<64x64xf32>
    %21 = vector.extract_strided_slice %1 {offsets = [1, 0, 0], sizes = [8, 8, 16], strides = [1, 1, 1]} : vector<10x10x16xf32> to vector<8x8x16xf32>
    %22 = vector.shape_cast %21 : vector<8x8x16xf32> to vector<64x16xf32>
    %c3 = arith.constant 3 : index
    %c0_13 = arith.constant 0 : index
    %c0_14 = arith.constant 0 : index
    %23 = vector.load %arg2[%c3, %c0_13, %c0_14] : memref<9x16x64xf32, #tpu.memory_space<vmem>>, vector<1x16x64xf32>
    %24 = vector.shape_cast %23 : vector<1x16x64xf32> to vector<16x64xf32>
    %cst_15 = arith.constant dense<0.000000e+00> : vector<64x64xf32>
    %25 = tpu.matmul %22, %24, %cst_15 {dimension_numbers = #tpu.dot_dimension_numbers<[1], [0], [0], [1], [0, 0, 1, 1], [], []>} : vector<64x16xf32>, vector<16x64xf32>, vector<64x64xf32> -> vector<64x64xf32>
    %26 = arith.addf %20, %25 : vector<64x64xf32>
    %27 = vector.extract_strided_slice %1 {offsets = [1, 1, 0], sizes = [8, 8, 16], strides = [1, 1, 1]} : vector<10x10x16xf32> to vector<8x8x16xf32>
    %28 = vector.shape_cast %27 : vector<8x8x16xf32> to vector<64x16xf32>
    %c4 = arith.constant 4 : index
    %c0_16 = arith.constant 0 : index
    %c0_17 = arith.constant 0 : index
    %29 = vector.load %arg2[%c4, %c0_16, %c0_17] : memref<9x16x64xf32, #tpu.memory_space<vmem>>, vector<1x16x64xf32>
    %30 = vector.shape_cast %29 : vector<1x16x64xf32> to vector<16x64xf32>
    %cst_18 = arith.constant dense<0.000000e+00> : vector<64x64xf32>
    %31 = tpu.matmul %28, %30, %cst_18 {dimension_numbers = #tpu.dot_dimension_numbers<[1], [0], [0], [1], [0, 0, 1, 1], [], []>} : vector<64x16xf32>, vector<16x64xf32>, vector<64x64xf32> -> vector<64x64xf32>
    %32 = arith.addf %26, %31 : vector<64x64xf32>
    %33 = vector.extract_strided_slice %1 {offsets = [1, 2, 0], sizes = [8, 8, 16], strides = [1, 1, 1]} : vector<10x10x16xf32> to vector<8x8x16xf32>
    %34 = vector.shape_cast %33 : vector<8x8x16xf32> to vector<64x16xf32>
    %c5 = arith.constant 5 : index
    %c0_19 = arith.constant 0 : index
    %c0_20 = arith.constant 0 : index
    %35 = vector.load %arg2[%c5, %c0_19, %c0_20] : memref<9x16x64xf32, #tpu.memory_space<vmem>>, vector<1x16x64xf32>
    %36 = vector.shape_cast %35 : vector<1x16x64xf32> to vector<16x64xf32>
    %cst_21 = arith.constant dense<0.000000e+00> : vector<64x64xf32>
    %37 = tpu.matmul %34, %36, %cst_21 {dimension_numbers = #tpu.dot_dimension_numbers<[1], [0], [0], [1], [0, 0, 1, 1], [], []>} : vector<64x16xf32>, vector<16x64xf32>, vector<64x64xf32> -> vector<64x64xf32>
    %38 = arith.addf %32, %37 : vector<64x64xf32>
    %39 = vector.extract_strided_slice %1 {offsets = [2, 0, 0], sizes = [8, 8, 16], strides = [1, 1, 1]} : vector<10x10x16xf32> to vector<8x8x16xf32>
    %40 = vector.shape_cast %39 : vector<8x8x16xf32> to vector<64x16xf32>
    %c6 = arith.constant 6 : index
    %c0_22 = arith.constant 0 : index
    %c0_23 = arith.constant 0 : index
    %41 = vector.load %arg2[%c6, %c0_22, %c0_23] : memref<9x16x64xf32, #tpu.memory_space<vmem>>, vector<1x16x64xf32>
    %42 = vector.shape_cast %41 : vector<1x16x64xf32> to vector<16x64xf32>
    %cst_24 = arith.constant dense<0.000000e+00> : vector<64x64xf32>
    %43 = tpu.matmul %40, %42, %cst_24 {dimension_numbers = #tpu.dot_dimension_numbers<[1], [0], [0], [1], [0, 0, 1, 1], [], []>} : vector<64x16xf32>, vector<16x64xf32>, vector<64x64xf32> -> vector<64x64xf32>
    %44 = arith.addf %38, %43 : vector<64x64xf32>
    %45 = vector.extract_strided_slice %1 {offsets = [2, 1, 0], sizes = [8, 8, 16], strides = [1, 1, 1]} : vector<10x10x16xf32> to vector<8x8x16xf32>
    %46 = vector.shape_cast %45 : vector<8x8x16xf32> to vector<64x16xf32>
    %c7 = arith.constant 7 : index
    %c0_25 = arith.constant 0 : index
    %c0_26 = arith.constant 0 : index
    %47 = vector.load %arg2[%c7, %c0_25, %c0_26] : memref<9x16x64xf32, #tpu.memory_space<vmem>>, vector<1x16x64xf32>
    %48 = vector.shape_cast %47 : vector<1x16x64xf32> to vector<16x64xf32>
    %cst_27 = arith.constant dense<0.000000e+00> : vector<64x64xf32>
    %49 = tpu.matmul %46, %48, %cst_27 {dimension_numbers = #tpu.dot_dimension_numbers<[1], [0], [0], [1], [0, 0, 1, 1], [], []>} : vector<64x16xf32>, vector<16x64xf32>, vector<64x64xf32> -> vector<64x64xf32>
    %50 = arith.addf %44, %49 : vector<64x64xf32>
    %51 = vector.extract_strided_slice %1 {offsets = [2, 2, 0], sizes = [8, 8, 16], strides = [1, 1, 1]} : vector<10x10x16xf32> to vector<8x8x16xf32>
    %52 = vector.shape_cast %51 : vector<8x8x16xf32> to vector<64x16xf32>
    %c8 = arith.constant 8 : index
    %c0_28 = arith.constant 0 : index
    %c0_29 = arith.constant 0 : index
    %53 = vector.load %arg2[%c8, %c0_28, %c0_29] : memref<9x16x64xf32, #tpu.memory_space<vmem>>, vector<1x16x64xf32>
    %54 = vector.shape_cast %53 : vector<1x16x64xf32> to vector<16x64xf32>
    %cst_30 = arith.constant dense<0.000000e+00> : vector<64x64xf32>
    %55 = tpu.matmul %52, %54, %cst_30 {dimension_numbers = #tpu.dot_dimension_numbers<[1], [0], [0], [1], [0, 0, 1, 1], [], []>} : vector<64x16xf32>, vector<16x64xf32>, vector<64x64xf32> -> vector<64x64xf32>
    %56 = arith.addf %50, %55 : vector<64x64xf32>
    %c0_31 = arith.constant 0 : index
    %c0_32 = arith.constant 0 : index
    %57 = vector.load %arg3[%c0_31, %c0_32] : memref<1x64xf32, #tpu.memory_space<vmem>>, vector<1x64xf32>
    %58 = vector.broadcast %57 : vector<1x64xf32> to vector<64x64xf32>
    %59 = arith.addf %56, %58 : vector<64x64xf32>
    %cst_33 = arith.constant 0.000000e+00 : f32
    %60 = vector.broadcast %cst_33 : f32 to vector<64x64xf32>
    %61 = arith.cmpf ogt, %59, %60 : vector<64x64xf32>
    %62 = math.exp %59 : vector<64x64xf32>
    %cst_34 = arith.constant 1.000000e+00 : f32
    %63 = vector.broadcast %cst_34 : f32 to vector<64x64xf32>
    %64 = arith.subf %62, %63 : vector<64x64xf32>
    %cst_35 = arith.constant 1.67326319 : f32
    %65 = vector.broadcast %cst_35 : f32 to vector<64x64xf32>
    %66 = arith.mulf %65, %64 : vector<64x64xf32>
    %67 = arith.select %61, %59, %66 : vector<64x64xi1>, vector<64x64xf32>
    %cst_36 = arith.constant 1.05070102 : f32
    %68 = vector.broadcast %cst_36 : f32 to vector<64x64xf32>
    %69 = arith.mulf %68, %67 : vector<64x64xf32>
    %70 = vector.shape_cast %69 : vector<64x64xf32> to vector<8x8x64xf32>
    %c0_37 = arith.constant 0 : index
    %c0_38 = arith.constant 0 : index
    %c0_39 = arith.constant 0 : index
    %c0_40 = arith.constant 0 : index
    %71 = vector.load %arg4[%c0_37, %c0_38, %c0_39, %c0_40] : memref<1x8x8x64xf32, #tpu.memory_space<vmem>>, vector<1x8x8x64xf32>
    %72 = vector.shape_cast %71 : vector<1x8x8x64xf32> to vector<8x8x64xf32>
    %73 = vector.shape_cast %70 : vector<8x8x64xf32> to vector<1x8x8x64xf32>
    tpu.vector_store %arg4[%c0_37, %c0_38, %c0_39, %c0_40], %73 {strides = array<i32>} : memref<1x8x8x64xf32, #tpu.memory_space<vmem>>, vector<1x8x8x64xf32>,
    return
  }
  func.func @transform_0(%arg0: i32) -> (i32, i32, i32, i32) {
    %c0_i32 = arith.constant 0 : i32
    %c0_i32_0 = arith.constant 0 : i32
    %c0_i32_1 = arith.constant 0 : i32
    %c0_i32_2 = arith.constant 0 : i32
    return %arg0, %c0_i32, %c0_i32_0, %c0_i32_1 : i32, i32, i32, i32
  }
  func.func @transform_1(%arg0: i32) -> (i32, i32, i32) {
    %c0_i32 = arith.constant 0 : i32
    %c0_i32_0 = arith.constant 0 : i32
    %c0_i32_1 = arith.constant 0 : i32
    %c0_i32_2 = arith.constant 0 : i32
    return %c0_i32, %c0_i32_0, %c0_i32_1 : i32, i32, i32
  }
  func.func @transform_2(%arg0: i32) -> (i32, i32) {
    %c0_i32 = arith.constant 0 : i32
    %c0_i32_0 = arith.constant 0 : i32
    %c0_i32_1 = arith.constant 0 : i32
    return %c0_i32, %c0_i32_0 : i32, i32
  }
  func.func @transform_3(%arg0: i32) -> (i32, i32, i32, i32) {
    %c0_i32 = arith.constant 0 : i32
    %c0_i32_0 = arith.constant 0 : i32
    %c0_i32_1 = arith.constant 0 : i32
    %c0_i32_2 = arith.constant 0 : i32
    return %arg0, %c0_i32, %c0_i32_0, %c0_i32_1 : i32, i32, i32, i32
  }
}

</mosaic_0001>

<bundles_post_ra>
// kernel: tpu_custom_call.1
= control target key start
LH: loop header
LB: loop body
LE: loop exit
PB: predicated region body
PF: predicated region fallthrough
CT: control target
= control target key end

     0   :  { %8 = vsyncpa [#allocation3], 0  ;;  %s2482_s0 = inlined_call_operand.vmem [shape: f32[2,10,10,16], index: 0, kind: input, shape index: {}]   ;;  %s2483_s1 = inlined_call_operand.vmem [shape: f32[9,16,64], index: 1, kind: input, shape index: {}]   ;;  %s2484_s2 = inlined_call_operand.vmem [shape: f32[1,64], index: 2, kind: input, shape index: {}]   ;;  %s2485_s3 = inlined_call_operand.hbm [shape: f32[2,8,8,64], index: 3, kind: output, shape index: {}]  }
   0x1   :  { %10 = vsyncpa [#allocation3 + $0x1], 0  ;;  %s2005_s12 = smov 0   ;;  %s2007_s13 = smov 0  }
   0x2   :  { %s2009_s14 = smov 0   ;;  %s2011_s15 = smov 0  }
   0x3 LB: > { %s2026_s16 = sadd.s32 4294967295, %s1980_s15   ;;  %s1515_s17 = sadd.s32 4294967294, %s1980_s15   ;;  %s1980_s15 = sphi %s2011_s15, %s2491_s15   ;;  %s1976_s14 = sphi %s2009_s14, %s2490_s14   ;;  %s1972_s13 = sphi %s2007_s13, %s2489_s13   ;;  %s1968_s12 = sphi %s2005_s12, %s2488_s12  }
   0x4   : > { %s2030_s18 = sadd.s32 1, %s1980_s15   ;;  %s91_s19 = sadd.s32 1, %s1976_s14 }
   0x5   : > { %s88_s20 = ssub.s32 %s1980_s15, %s2030_s18  ;;  %p101_p0 = scmp.ne.s32.totalorder %s1976_s14, %s1972_s13 }
   0x6   : > { %p89_p1 = scmp.eq.s32.totalorder %s88_s20, 0  ;;  %p102_p2 = scmp.eq.s32.totalorder %s2026_s16, 1 }
   0x7   : > { %p107_p3 = scmp.ne.s32.totalorder %s1972_s13, %s1968_s12  ;;  %p108_p4 = scmp.eq.s32.totalorder %s1515_s17, 1 }
   0x8   : > { %s2041_s21 = scalar_select %p89_p1, %s1976_s14, %s91_s19  }
   0x9   : > { %p2043_p5 = por %p102_p2, %p101_p0  ;;  %p2047_p6 = por %p108_p4, %p107_p3 }
   0xa   : > { %p1518_p7 = scmp.ge.s32.totalorder %s1980_s15, 1  ;;  %p140_p8 = scmp.lt.s32.totalorder %s1980_s15, 3 }
   0xc   : > { %p141_p9 = pnand %p1518_p7, %p140_p8 }
   0xd   : > { %p164_p10 = scmp.lt.s32.totalorder (!%p141_p9), %s2026_s16, 1  ;;  %s161_s4 = sand.u32 (!%p141_p9), 1, %s1972_s13  }
   0xe   : > { %144 = sbr.rel (%p141_p9) target bundleno = 337 (0x151), region = 32  ;;  %s1519_s5 = sshll.u32 (!%p141_p9), %s161_s4, 6 }
   0xf   : > { %s1623_s7 = sshll.u32 (!%p141_p9), %s2026_s16, 10  ;;  %s1982_s20 = smov (!%p141_p9), [#allocation2]  }
  0x10   : > { %s2432_s17 = scalar_lea.hbm (!%p141_p9), %s2485_s3, %s1623_s7 }
  0x13   : > { %v1522_v0 = vld [vmem:[%s2483_s1 + $0x18] sm:$0xff]  ;;  %v1521_v1 = vld [vmem:[%s2483_s1 + $0x10] sm:$0xff]  ;;  %s165_s28 = scalar_select %p164_p10, %s2026_s16, 1  ;;  %v190_v2 = vld [vmem:[%s2483_s1 + $0x8] sm:$0xff]  ;;  %vm207_vm0 = vcmask 1046528   ;;  %vm235_vm1 = vcmask 130048  }
  0x14   : > { %1858 = vmatprep.subr.mxu1 %v1522_v0  ;;  %1714 = vmatprep.subr.mxu0 %v1522_v0  ;;  %v1540_v3 = vld [vmem:[%s2483_s1 + $0x28] sm:$0xff]  ;;  %vm478_vm2 = vcmask 1045504   ;;  %v189_v29 = vld [vmem:[%s2483_s1] sm:$0xff]  ;;  %v1550_v51 = vld [vmem:[%s2483_s1 + $0x38] sm:$0xff]  ;;  %vm1430_vm4 = vcmask 523264   ;;  %s2442_s16 = scalar_lea.sflag [#allocation3], %s161_s4 }
  0x15   : > { %1860 = vmatpush3.msra.mxu1 %v1522_v0  ;;  %1715 = vmatpush3.msra.mxu0 %v1522_v0  ;;  %s1862_s6 = smul.u32 160, %s165_s28  ;;  %v1539_v46 = vld [vmem:[%s2483_s1 + $0x20] sm:$0xff]  ;;  %v1560_v55 = vld [vmem:[%s2483_s1 + $0x48] sm:$0xff]  ;;  %v1549_v63 = vld [vmem:[%s2483_s1 + $0x30] sm:$0xff] }
  0x16   : > { %1859 = vmatprep.subr.mxu1 %v1521_v1  ;;  %1716 = vmatprep.subr.mxu0 %v1521_v1 }
  0x17   : > { %1861 = vmatpush3.msra.mxu1 %v1521_v1  ;;  %1717 = vmatpush3.msra.mxu0 %v1521_v1  ;;  %s2070_s9 = scalar_lea.vmem %s2482_s0, %s1862_s6  ;;  %s2409_s6 = scalar_lea.vmem [#allocation2], %s1519_s5 }
  0x18   : > { %1730 = vmatprep.subr.mxu1 %v190_v2  ;;  %1746 = vmatprep.subr.mxu0 %v1540_v3  ;;  %v2073_v4 = vld [vmem:[%s2070_s9] sm:$0xff]  ;;  %v170_v5 = vld [vmem:[%s2070_s9 + $0x8] sm:$0x3]  ;;  %v2086_v13 = vld [vmem:[%s2070_s9 + $0x10] sm:$0xff]  ;;  %s1453_s8 = sshll.u32 %s2409_s6, 4  ;;  %s2434_s8 = int_to_ptr.vmem [resolvable:$true] %s1453_s8 }
  0x19   : > { %v2077_v6 = vld [vmem:[%s2070_s9 + $0x40] sm:$0xff]  ;;  %v208_v7 = vrot.slane %v2073_v4, 1  ;;  %v209_v8 = vrot.slane %v170_v5, 1  ;;  %v480_v9 = vrot.slane %v170_v5, 2  ;;  %v2081_v10 = vld [vmem:[%s2070_s9 + $0x48] sm:$0x3] }
  0x1a   : > { %v220_v11 = vrot.slane %v2077_v6, 1  ;;  %v221_v12 = vrot.slane %v2081_v10, 1  ;;  %v172_v14 = vld [vmem:[%s2070_s9 + $0x18] sm:$0x3]  ;;  %v2090_v15 = vld [vmem:[%s2070_s9 + $0x50] sm:$0xff]  ;;  %v479_v16 = vrot.slane %v2073_v4, 2 }
  0x1b   : > { %v210_v17 = vsel %vm207_vm0, %v208_v7, %v209_v8  ;;  %v211_v18 = vrot.slane %v2086_v13, 1  ;;  %v212_v19 = vrot.slane %v172_v14, 1  ;;  %v483_v20 = vrot.slane %v172_v14, 2  ;;  %v2096_v21 = vld [vmem:[%s2070_s9 + $0x58] sm:$0x3]  ;;  %v2099_v22 = vld [vmem:[%s2070_s9 + $0x20] sm:$0xff] }
  0x1c   : > { %1718 = vmatprep.mubr.msk.f32.mxu0 %vm235_vm1, %v210_v17  ;;  %v2103_v23 = vsel %vm207_vm0, %v220_v11, %v221_v12  ;;  %v223_v24 = vrot.slane %v2090_v15, 1  ;;  %v224_v25 = vrot.slane %v2096_v21, 1  ;;  %v174_v26 = vld [vmem:[%s2070_s9 + $0x28] sm:$0x3]  ;;  %v214_v27 = vrot.slane %v2099_v22, 1  ;;  %v2110_v28 = vld [vmem:[%s2070_s9 + $0x60] sm:$0xff] }
  0x1d   : > { %1724 = vmatprep.mubr.msk.f32.mxu1 %vm235_vm1, %v2103_v23  ;;  %v2118_v30 = vsel %vm207_vm0, %v211_v18, %v212_v19  ;;  %v215_v31 = vrot.slane %v174_v26, 1  ;;  %v2121_v32 = vld [vmem:[%s2070_s9 + $0x68] sm:$0x3]  ;;  %v226_v33 = vrot.slane %v2110_v28, 1  ;;  %v2125_v34 = vld [vmem:[%s2070_s9 + $0x30] sm:$0xff]  ;;  %v482_v47 = vrot.slane %v2086_v13, 2 }
  0x1e   : > { %v2128_v35 = vld [vmem:[%s2070_s9 + $0x70] sm:$0xff]  ;;  %1719 = vmatmul.mubr.msk.f32.vlgmr.msra.gmra.mxu0 %vm235_vm1, %v2118_v30  ;;  %v2133_v36 = vsel %vm207_vm0, %v223_v24, %v224_v25  ;;  %v227_v37 = vrot.slane %v2121_v32, 1  ;;  %v176_v38 = vld [vmem:[%s2070_s9 + $0x38] sm:$0x3]  ;;  %v217_v39 = vrot.slane %v2125_v34, 1  ;;  %v481_v50 = vsel %vm478_vm2, %v479_v16, %v480_v9  ;;  %v1559_v9 = vld [vmem:[%s2483_s1 + $0x40] sm:$0xff] }
  0x1f   : > { %v2139_v40 = vld [vmem:[%s2070_s9 + $0x78] sm:$0x3]  ;;  %1725 = vmatmul.mubr.msk.f32.vlgmr.msra.gmra.mxu1 %vm235_vm1, %v2133_v36  ;;  %1747 = vmatpush3.msra.mxu0 %v1540_v3  ;;  %v2144_v41 = vsel %vm207_vm0, %v214_v27, %v215_v31  ;;  %v218_v42 = vrot.slane %v176_v38, 1  ;;  %v229_v43 = vrot.slane %v2128_v35, 1  ;;  %v485_v52 = vrot.slane %v2099_v22, 2  ;;  %v2190_v61 = vld [vmem:[%s2070_s9 + $0x90] sm:$0xff] }
  0x20   : > { %v230_v44 = vrot.slane %v2139_v40, 1  ;;  %1731 = vmatpush3.msra.mxu1 %v190_v2  ;;  %1721 = vmatprep.mubr.msk.f32.mxu0 %vm235_vm1, %v2144_v41  ;;  %v2151_v45 = vsel %vm207_vm0, %v226_v33, %v227_v37  ;;  %v486_v53 = vrot.slane %v174_v26, 2  ;;  %v2175_v54 = vsel %vm478_vm2, %v482_v47, %v483_v20  ;;  %v2186_v60 = vld [vmem:[%s2070_s9 + $0x98] sm:$0x3]  ;;  %v1580_v17 = vld [vmem:[%s2483_s1 + $0x68] sm:$0xff]  ;;  %v1569_v20 = vld [vmem:[%s2483_s1 + $0x50] sm:$0xff] }
  0x21   : > { %1727 = vmatprep.mubr.msk.f32.mxu1 %vm235_vm1, %v2151_v45  ;;  %1732 = vmatprep.subr.mxu1 %v189_v29  ;;  %v2160_v48 = vsel %vm207_vm0, %v217_v39, %v218_v42  ;;  %v488_v56 = vrot.slane %v2125_v34, 2  ;;  %v489_v57 = vrot.slane %v176_v38, 2  ;;  %v491_v58 = vrot.slane %v2077_v6, 2  ;;  %v1570_v11 = vld [vmem:[%s2483_s1 + $0x58] sm:$0xff]  ;;  %v186_v24 = vld [vmem:[%s2070_s9 + $0x88] sm:$0x3] }
  0x22   : > { %v2163_v49 = vsel %vm207_vm0, %v229_v43, %v230_v44  ;;  %1722 = vmatmul.mubr.msk.f32.gmra.mxu0 %vm235_vm1, %v2160_v48  ;;  %1733 = vmatpush3.msra.mxu1 %v189_v29  ;;  %v492_v59 = vrot.slane %v2081_v10, 2  ;;  %v2195_v62 = vsel %vm478_vm2, %v485_v52, %v486_v53  ;;  %v1117_v0 = vrot.slane %v2190_v61, 1  ;;  %v1590_v25 = vld [vmem:[%s2483_s1 + $0x78] sm:$0xff]  ;;  %v1600_v29 = vld [vmem:[%s2483_s1 + $0x88] sm:$0xff]  ;;  %v1589_v31 = vld [vmem:[%s2483_s1 + $0x70] sm:$0xff]  ;;  %s1920_s19 = scalar_lea.vmem %s2434_s8, 1024 }
  0x23   : > { %1728 = vmatmul.mubr.msk.f32.gmra.mxu1 %vm235_vm1, %v2163_v49  ;;  %1748 = vmatprep.subr.mxu0 %v1539_v46  ;;  %v2204_v1 = vsel %vm478_vm2, %v488_v56, %v489_v57  ;;  %v494_v2 = vrot.slane %v2090_v15, 2  ;;  %v495_v3 = vrot.slane %v2096_v21, 2  ;;  %v497_v7 = vrot.slane %v2110_v28, 2  ;;  %v185_v21 = vld [vmem:[%s2070_s9 + $0x80] sm:$0xff]  ;;  %p1921_p11 = scmp.ne.s32.totalorder %s2434_s8, %s1920_s19  ;;  %s1924_s9 = sshll.u32 %s1982_s20, 4  ;;  %s1925_s9 = int_to_ptr.vmem [resolvable:$false] %s1924_s9 }
  0x24   : > { %1749 = vmatpush3.msra.mxu0 %v1539_v46  ;;  %1734 = vmatprep.mubr.msk.f32.mxu1 %vm235_vm1, %v2073_v4  ;;  %v1118_v4 = vrot.slane %v2186_v60, 1  ;;  %v2212_v5 = vsel %vm478_vm2, %v491_v58, %v492_v59  ;;  %v498_v8 = vrot.slane %v2121_v32, 2  ;;  %v500_v14 = vrot.slane %v2128_v35, 2  ;;  %s1926_s24 = scalar_lea.vmem %s1925_s9, 2048  ;;  %p1927_p0 = scmp.lt.s32.totalorder %s2434_s8, %s1925_s9 }
  0x25   : > { %1750 = vmatprep.mubr.msk.f32.mxu0 %vm235_vm1, %v481_v50  ;;  %1762 = vmatprep.subr.mxu1 %v1550_v51  ;;  %v2234_v12 = vsel %vm478_vm2, %v494_v2, %v495_v3  ;;  %v501_v16 = vrot.slane %v2139_v40, 2  ;;  %v755_v26 = vrot.slane %v185_v21, 1  ;;  %v756_v27 = vrot.slane %v186_v24, 1  ;;  %p1922_p12 = pnand %p1921_p11, %p2043_p5  ;;  %p1928_p1 = scmp.lt.s32.totalorder %s1926_s24, %s1920_s19 }
  0x26   : > { %1751 = vmatmul.mubr.msk.f32.vlgmr.msra.gmra.mxu0 %vm235_vm1, %v2175_v54  ;;  %1778 = vmatprep.subr.mxu0 %v1560_v55  ;;  %v2222_v10 = vsel %vm207_vm0, %v1117_v0, %v1118_v4  ;;  %v2244_v18 = vsel %vm478_vm2, %v497_v7, %v498_v8  ;;  %v876_v32 = vrot.slane %v185_v21, 2  ;;  %v1239_v33 = vrot.slane %v2186_v60, 2 }
  0x27   : > { %1735 = vmatmul.mubr.msk.f32.vlgmr.msra.gmra.mxu1 %vm235_vm1, %v2086_v13  ;;  %1779 = vmatpush3.msra.mxu0 %v1560_v55  ;;  %v2253_v19 = vsel %vm478_vm2, %v500_v14, %v501_v16  ;;  %p1923_p13 = pneg %p1922_p12  ;;  %p1929_p2 = por %p1928_p1, %p1927_p0 }
  0x28   : > { %1763 = vmatpush3.msra.mxu1 %v1550_v51  ;;  %1737 = vmatprep.mubr.msk.f32.mxu1 %vm235_vm1, %v2099_v22 }
  0x29   : > { %1753 = vmatprep.mubr.msk.f32.mxu0 %vm235_vm1, %v2195_v62  ;;  %1764 = vmatprep.subr.mxu1 %v1549_v63  ;;  %p1930_p3 = pnand %p1929_p2, %p1923_p13 }
  0x2a   : > { %1754 = vmatmul.mubr.msk.f32.gmra.mxu0 %vm235_vm1, %v2204_v1  ;;  %1765 = vmatpush3.msra.mxu1 %v1549_v63 }
  0x2b   : > { %1738 = vmatmul.mubr.msk.f32.gmra.mxu1 %vm235_vm1, %v2125_v34  ;;  %1756 = vmatprep.mubr.msk.f32.mxu0 %vm235_vm1, %v2212_v5 }
  0x2c   : > { %1740 = vmatprep.mubr.msk.f32.mxu1 %vm235_vm1, %v2077_v6  ;;  %1780 = vmatprep.subr.mxu0 %v1559_v9 }
  0x2d   : > { %1781 = vmatpush3.msra.mxu0 %v1559_v9  ;;  %1794 = vmatprep.subr.mxu1 %v1570_v11 }
  0x2e   : > { %1757 = vmatmul.mubr.msk.f32.gmra.mxu0 %vm235_vm1, %v2234_v12  ;;  %1810 = vmatprep.subr.mxu0 %v1580_v17 }
  0x2f   : > { %1741 = vmatmul.mubr.msk.f32.gmra.mxu1 %vm235_vm1, %v2090_v15  ;;  %1759 = vmatprep.mubr.msk.f32.mxu0 %vm235_vm1, %v2244_v18 }
  0x30   : > { %1743 = vmatprep.mubr.msk.f32.mxu1 %vm235_vm1, %v2110_v28 }
  0x32   : > { %1760 = vmatmul.mubr.msk.f32.gmra.mxu0 %vm235_vm1, %v2253_v19 }
  0x33   : > { %1744 = vmatmul.mubr.msk.f32.gmra.mxu1 %vm235_vm1, %v2128_v35  ;;  %1782 = vmatprep.mubr.msk.f32.mxu0 %vm235_vm1, %v2118_v30  ;;  %v757_v30 = vsel %vm207_vm0, %v755_v26, %v756_v27 }
  0x34   : > { %1766 = vmatprep.mubr.msk.f32.mxu1 %vm235_vm1, %v2086_v13  ;;  %v1579_v13 = vld [vmem:[%s2483_s1 + $0x60] sm:$0xff] }
  0x36   : > { %1783 = vmatmul.mubr.msk.f32.vlgmr.msra.gmra.mxu0 %vm235_vm1, %v2144_v41 }
  0x37   : > { %1767 = vmatmul.mubr.msk.f32.vlgmr.msra.gmra.mxu1 %vm235_vm1, %v2099_v22  ;;  %1811 = vmatpush3.msra.mxu0 %v1580_v17 }
  0x38   : > { %1795 = vmatpush3.msra.mxu1 %v1570_v11  ;;  %1769 = vmatprep.mubr.msk.f32.mxu1 %vm235_vm1, %v2125_v34 }
  0x39   : > { %1785 = vmatprep.mubr.msk.f32.mxu0 %vm235_vm1, %v2160_v48  ;;  %1796 = vmatprep.subr.mxu1 %v1569_v20 }
  0x3a   : > { %1786 = vmatmul.mubr.msk.f32.gmra.mxu0 %vm235_vm1, %v2103_v23  ;;  %1797 = vmatpush3.msra.mxu1 %v1569_v20 }
  0x3b   : > { %1770 = vmatmul.mubr.msk.f32.gmra.mxu1 %vm235_vm1, %v2077_v6  ;;  %1788 = vmatprep.mubr.msk.f32.mxu0 %vm235_vm1, %v2133_v36 }
  0x3c   : > { %1772 = vmatprep.mubr.msk.f32.mxu1 %vm235_vm1, %v2090_v15  ;;  %1812 = vmatprep.subr.mxu0 %v1579_v13 }
  0x3d   : > { %1813 = vmatpush3.msra.mxu0 %v1579_v13  ;;  %1826 = vmatprep.subr.mxu1 %v1590_v25 }
  0x3e   : > { %1789 = vmatmul.mubr.msk.f32.gmra.mxu0 %vm235_vm1, %v2151_v45  ;;  %1842 = vmatprep.subr.mxu0 %v1600_v29 }
  0x3f   : > { %1773 = vmatmul.mubr.msk.f32.gmra.mxu1 %vm235_vm1, %v2110_v28  ;;  %1791 = vmatprep.mubr.msk.f32.mxu0 %vm235_vm1, %v2163_v49 }
  0x40   : > { %1775 = vmatprep.mubr.msk.f32.mxu1 %vm235_vm1, %v2128_v35 }
  0x42   : > { %1792 = vmatmul.mubr.msk.f32.gmra.mxu0 %vm235_vm1, %v757_v30 }
  0x43   : > { %1776 = vmatmul.mubr.msk.f32.gmra.mxu1 %vm235_vm1, %v185_v21  ;;  %1814 = vmatprep.mubr.msk.f32.mxu0 %vm235_vm1, %v2099_v22  ;;  %v1599_v22 = vld [vmem:[%s2483_s1 + $0x80] sm:$0xff] }
  0x44   : > { %1798 = vmatprep.mubr.msk.f32.mxu1 %vm235_vm1, %v2175_v54 }
  0x46   : > { %1815 = vmatmul.mubr.msk.f32.vlgmr.msra.gmra.mxu0 %vm235_vm1, %v2125_v34 }
  0x47   : > { %1799 = vmatmul.mubr.msk.f32.vlgmr.msra.gmra.mxu1 %vm235_vm1, %v2195_v62  ;;  %1843 = vmatpush3.msra.mxu0 %v1600_v29 }
  0x48   : > { %1827 = vmatpush3.msra.mxu1 %v1590_v25  ;;  %1801 = vmatprep.mubr.msk.f32.mxu1 %vm235_vm1, %v2204_v1 }
  0x49   : > { %1817 = vmatprep.mubr.msk.f32.mxu0 %vm235_vm1, %v2077_v6  ;;  %1828 = vmatprep.subr.mxu1 %v1589_v31  ;;  %v877_v6 = vrot.slane %v186_v24, 2 }
  0x4a   : > { %1818 = vmatmul.mubr.msk.f32.gmra.mxu0 %vm235_vm1, %v2090_v15  ;;  %1829 = vmatpush3.msra.mxu1 %v1589_v31 }
  0x4b   : > { %1802 = vmatmul.mubr.msk.f32.gmra.mxu1 %vm235_vm1, %v2212_v5  ;;  %1820 = vmatprep.mubr.msk.f32.mxu0 %vm235_vm1, %v2110_v28  ;;  %v878_v15 = vsel %vm478_vm2, %v876_v32, %v877_v6  ;;  %v1238_v28 = vrot.slane %v2190_v61, 2 }
  0x4c   : > { %1804 = vmatprep.mubr.msk.f32.mxu1 %vm235_vm1, %v2234_v12  ;;  %1844 = vmatprep.subr.mxu0 %v1599_v22 }
  0x4d   : > { %1845 = vmatpush3.msra.mxu0 %v1599_v22 }
  0x4e   : > { %1821 = vmatmul.mubr.msk.f32.gmra.mxu0 %vm235_vm1, %v2128_v35 }
  0x4f   : > { %1805 = vmatmul.mubr.msk.f32.gmra.mxu1 %vm235_vm1, %v2244_v18  ;;  %1823 = vmatprep.mubr.msk.f32.mxu0 %vm235_vm1, %v185_v21 }
  0x50   : > { %1807 = vmatprep.mubr.msk.f32.mxu1 %vm235_vm1, %v2253_v19 }
  0x52   : > { %1824 = vmatmul.mubr.msk.f32.gmra.mxu0 %vm235_vm1, %v2190_v61 }
  0x53   : > { %1808 = vmatmul.mubr.msk.f32.gmra.mxu1 %vm235_vm1, %v878_v15  ;;  %1846 = vmatprep.mubr.msk.f32.mxu0 %vm235_vm1, %v2195_v62 }
  0x54   : > { %1830 = vmatprep.mubr.msk.f32.mxu1 %vm235_vm1, %v2144_v41 }
  0x56   : > { %1847 = vmatmul.mubr.msk.f32.vlgmr.msra.gmra.mxu0 %vm235_vm1, %v2204_v1 }
  0x57   : > { %1831 = vmatmul.mubr.msk.f32.vlgmr.msra.gmra.mxu1 %vm235_vm1, %v2160_v48  ;;  %1849 = vmatprep.mubr.msk.f32.mxu0 %vm235_vm1, %v2212_v5 }
  0x58   : > { %1833 = vmatprep.mubr.msk.f32.mxu1 %vm235_vm1, %v2103_v23  ;;  %v1240_v23 = vsel %vm478_vm2, %v1238_v28, %v1239_v33 }
  0x5a   : > { %1850 = vmatmul.mubr.msk.f32.gmra.mxu0 %vm235_vm1, %v2234_v12 }
  0x5b   : > { %1834 = vmatmul.mubr.msk.f32.gmra.mxu1 %vm235_vm1, %v2133_v36  ;;  %1852 = vmatprep.mubr.msk.f32.mxu0 %vm235_vm1, %v2244_v18 }
  0x5c   : > { %1836 = vmatprep.mubr.msk.f32.mxu1 %vm235_vm1, %v2151_v45 }
  0x5e   : > { %1853 = vmatmul.mubr.msk.f32.gmra.mxu0 %vm235_vm1, %v2253_v19 }
  0x5f   : > { %1837 = vmatmul.mubr.msk.f32.gmra.mxu1 %vm235_vm1, %v2163_v49  ;;  %1855 = vmatprep.mubr.msk.f32.mxu0 %vm235_vm1, %v878_v15 }
  0x60   : > { %1839 = vmatprep.mubr.msk.f32.mxu1 %vm235_vm1, %v757_v30 }
  0x62   : > { %1856 = vmatmul.mubr.msk.f32.gmra.mxu0 %vm235_vm1, %v1240_v23 }
  0x63   : > { %1840 = vmatmul.mubr.msk.f32.gmra.mxu1 %vm235_vm1, %v2222_v10 }
  0xde   : > { %v1720_v34 = vpop.f32.mrf.mxu0 }
  0xdf   : > { %v1726_v35 = vpop.f32.mrf.mxu1 }
  0xe0   : > { %v318_v36 = vpop.f32.mrf.mxu0 }
  0xe1   : > { %v338_v37 = vpop.f32.mrf.mxu1 }
  0xe2   : > { %v1723_v38 = vpop.f32.mrf.mxu0 }
  0xe3   : > { %v1729_v39 = vpop.f32.mrf.mxu1 }
  0xe4   : > { %v328_v40 = vpop.f32.mrf.mxu0 }
  0xe5   : > { %v2375_v41 = vpop.f32.mrf.mxu1 }
  0xe6   : > { %v1752_v42 = vpop.f32.mrf.mxu0 }
  0xe7   : > { %v1736_v43 = vpop.f32.mrf.mxu1 }
  0xe8   : > { %v588_v44 = vpop.f32.mrf.mxu0  ;;  %v445_v11 = vadd.f32 %v1736_v43, %v1720_v34 }
  0xe9   : > { %v439_v45 = vpop.f32.mrf.mxu1 }
  0xea   : > { %v1755_v46 = vpop.f32.mrf.mxu0  ;;  %v440_v16 = vadd.f32 %v439_v45, %v318_v36  ;;  %v628_v19 = vadd.f32 %v1752_v42, %v445_v11 }
  0xeb   : > { %v1739_v47 = vpop.f32.mrf.mxu1 }
  0xec   : > { %v598_v48 = vpop.f32.mrf.mxu0  ;;  %v455_v20 = vadd.f32 %v1739_v47, %v1723_v38  ;;  %v627_v13 = vadd.f32 %v588_v44, %v440_v16 }
  0xed   : > { %v449_v49 = vpop.f32.mrf.mxu1 }
  0xee   : > { %v1758_v50 = vpop.f32.mrf.mxu0  ;;  %v450_v27 = vadd.f32 %v449_v49, %v328_v40  ;;  %v630_v30 = vadd.f32 %v1755_v46, %v455_v20 }
  0xef   : > { %v1742_v51 = vpop.f32.mrf.mxu1 }
  0xf0   : > { %v608_v52 = vpop.f32.mrf.mxu0  ;;  %v465_v32 = vadd.f32 %v1742_v51, %v1726_v35  ;;  %v629_v34 = vadd.f32 %v598_v48, %v450_v27 }
  0xf1   : > { %v459_v53 = vpop.f32.mrf.mxu1 }
  0xf2   : > { %v1761_v54 = vpop.f32.mrf.mxu0  ;;  %v460_v6 = vadd.f32 %v459_v53, %v338_v37  ;;  %v632_v44 = vadd.f32 %v1758_v50, %v465_v32 }
  0xf3   : > { %v1745_v55 = vpop.f32.mrf.mxu1 }
  0xf4   : > { %v2377_v56 = vpop.f32.mrf.mxu0  ;;  %v475_v42 = vadd.f32 %v1745_v55, %v1729_v39  ;;  %v631_v47 = vadd.f32 %v608_v52, %v460_v6 }
  0xf5   : > { %v469_v57 = vpop.f32.mrf.mxu1 }
  0xf6   : > { %v1784_v58 = vpop.f32.mrf.mxu0  ;;  %v470_v40 = vadd.f32 %v469_v57, %v2375_v41 }
  0xf7   : > { %v1768_v59 = vpop.f32.mrf.mxu1 }
  0xf8   : > { %v829_v60 = vpop.f32.mrf.mxu0  ;;  %v747_v25 = vadd.f32 %v1768_v59, %v628_v19  ;;  %v633_v39 = vadd.f32 %v2377_v56, %v470_v40 }
  0xf9   : > { %v707_v61 = vpop.f32.mrf.mxu1 }
  0xfa   : > { %v1787_v62 = vpop.f32.mrf.mxu0  ;;  %v746_v31 = vadd.f32 %v707_v61, %v627_v13  ;;  %v869_v28 = vadd.f32 %v1784_v58, %v747_v25  ;;  %v634_v58 = vadd.f32 %v1761_v54, %v475_v42 }
  0xfb   : > { %v1771_v63 = vpop.f32.mrf.mxu1 }
  0xfc   : > { %v839_v0 = vpop.f32.mrf.mxu0  ;;  %v749_v33 = vadd.f32 %v1771_v63, %v630_v30  ;;  %v868_v38 = vadd.f32 %v829_v60, %v746_v31 }
  0xfd   : > { %v717_v1 = vpop.f32.mrf.mxu1 }
  0xfe   : > { %v1790_v2 = vpop.f32.mrf.mxu0  ;;  %v748_v49 = vadd.f32 %v717_v1, %v629_v34  ;;  %v871_v59 = vadd.f32 %v1787_v62, %v749_v33 }
  0xff   : > { %v1774_v3 = vpop.f32.mrf.mxu1 }
 0x100   : > { %v849_v4 = vpop.f32.mrf.mxu0  ;;  %v751_v37 = vadd.f32 %v1774_v3, %v632_v44  ;;  %v870_v55 = vadd.f32 %v839_v0, %v748_v49  ;;  %v1609_v3 = vld [vmem:[%s2484_s2] ss:$0 sm:$0xff] }
 0x101   : > { %v727_v5 = vpop.f32.mrf.mxu1 }
 0x102   : > { %v2379_v7 = vpop.f32.mrf.mxu0  ;;  %v750_v51 = vadd.f32 %v727_v5, %v631_v47  ;;  %v873_v57 = vadd.f32 %v1790_v2, %v751_v37 }
 0x103   : > { %v1777_v8 = vpop.f32.mrf.mxu1 }
 0x104   : > { %v2381_v9 = vpop.f32.mrf.mxu0  ;;  %v753_v50 = vadd.f32 %v1777_v8, %v634_v58  ;;  %v872_v1 = vadd.f32 %v849_v4, %v750_v51 }
 0x105   : > { %v737_v10 = vpop.f32.mrf.mxu1 }
 0x106   : > { %v1816_v12 = vpop.f32.mrf.mxu0  ;;  %v752_v62 = vadd.f32 %v737_v10, %v633_v39  ;;  %v875_v8 = vadd.f32 %v2379_v7, %v753_v50 }
 0x107   : > { %v1800_v14 = vpop.f32.mrf.mxu1 }
 0x108   : > { %v1069_v17 = vpop.f32.mrf.mxu0  ;;  %v990_v43 = vadd.f32 %v1800_v14, %v869_v28 }
 0x109   : > { %v950_v18 = vpop.f32.mrf.mxu1 }
 0x10a   : > { %v1819_v21 = vpop.f32.mrf.mxu0  ;;  %v989_v61 = vadd.f32 %v950_v18, %v868_v38  ;;  %v1109_v63 = vadd.f32 %v1816_v12, %v990_v43 }
 0x10b   : > { %v1803_v24 = vpop.f32.mrf.mxu1 }
 0x10c   : > { %v1079_v26 = vpop.f32.mrf.mxu0  ;;  %v992_v48 = vadd.f32 %v1803_v24, %v871_v59  ;;  %v1108_v52 = vadd.f32 %v1069_v17, %v989_v61  ;;  %v874_v24 = vadd.f32 %v2381_v9, %v752_v62 }
 0x10d   : > { %v960_v29 = vpop.f32.mrf.mxu1 }
 0x10e   : > { %v1822_v22 = vpop.f32.mrf.mxu0  ;;  %v991_v16 = vadd.f32 %v960_v29, %v870_v55  ;;  %v1111_v5 = vadd.f32 %v1819_v21, %v992_v48 }
 0x10f   : > { %v1806_v15 = vpop.f32.mrf.mxu1 }
 0x110   : > { %v1089_v23 = vpop.f32.mrf.mxu0  ;;  %v994_v56 = vadd.f32 %v1806_v15, %v873_v57  ;;  %v1110_v13 = vadd.f32 %v1079_v26, %v991_v16 }
 0x111   : > { %v970_v36 = vpop.f32.mrf.mxu1 }
 0x112   : > { %v1825_v45 = vpop.f32.mrf.mxu0  ;;  %v993_v0 = vadd.f32 %v970_v36, %v872_v1  ;;  %v1113_v32 = vadd.f32 %v1822_v22, %v994_v56 }
 0x113   : > { %v1809_v46 = vpop.f32.mrf.mxu1 }
 0x114   : > { %v1099_v35 = vpop.f32.mrf.mxu0  ;;  %v996_v27 = vadd.f32 %v1809_v46, %v875_v8  ;;  %v1112_v6 = vadd.f32 %v1089_v23, %v993_v0 }
 0x115   : > { %v980_v53 = vpop.f32.mrf.mxu1 }
 0x116   : > { %v1848_v11 = vpop.f32.mrf.mxu0  ;;  %v995_v28 = vadd.f32 %v980_v53, %v874_v24  ;;  %v1115_v38 = vadd.f32 %v1825_v45, %v996_v27 }
 0x117   : > { %v1832_v60 = vpop.f32.mrf.mxu1 }
 0x118   : > { %v1231_v14 = vadd.f32 %v1832_v60, %v1109_v63  ;;  %v1312_v41 = vpop.f32.mrf.mxu0  ;;  %v1114_v23 = vadd.f32 %v1099_v35, %v995_v28 }
 0x119   : > { %v1191_v54 = vpop.f32.mrf.mxu1 }
 0x11a   : > { %v1352_v12 = vadd.f32 %v1848_v11, %v1231_v14  ;;  %v1230_v18 = vadd.f32 %v1191_v54, %v1108_v52  ;;  %v1851_v19 = vpop.f32.mrf.mxu0 }
 0x11b   : > { %v1835_v20 = vpop.f32.mrf.mxu1 }
 0x11c   : > { %v2389_v17 = vadd.f32 %v1609_v3, %v1352_v12  ;;  %v1351_v2 = vadd.f32 %v1312_v41, %v1230_v18  ;;  %v1233_v4 = vadd.f32 %v1835_v20, %v1111_v5  ;;  %v1322_v10 = vpop.f32.mrf.mxu0 }
 0x11d   : > { %v1201_v25 = vpop.f32.mrf.mxu1 }
 0x11e   : > { %v1384_v21 = vmul.f32 1.442695, %v2389_v17  ;;  %v2393_v29 = vadd.f32 %v1609_v3, %v1351_v2  ;;  %v1354_v30 = vadd.f32 %v1851_v19, %v1233_v4  ;;  %v1854_v31 = vpop.f32.mrf.mxu0  ;;  %v1232_v15 = vadd.f32 %v1201_v25, %v1110_v13 }
 0x11f   : > { %v1838_v7 = vpop.f32.mrf.mxu1  ;;  %vm1375_vm3 = vcmp.gt.f32.partialorder %v2389_v17, 0.0 }
 0x120   : > { %1904 = vpow2.f32 %v1384_v21  ;;  %v1382_v33 = vmul.f32 1.442695, %v2393_v29  ;;  %v1369_v34 = vadd.f32 %v1609_v3, %v1354_v30  ;;  %v1332_v36 = vpop.f32.mrf.mxu0  ;;  %v1353_v9 = vadd.f32 %v1322_v10, %v1232_v15 }
 0x121   : > { %v1235_v26 = vadd.f32 %v1838_v7, %v1113_v32  ;;  %v1211_v42 = vpop.f32.mrf.mxu1  ;;  %vm1374_vm5 = vcmp.gt.f32.partialorder %v2393_v29, 0.0 }
 0x122   : > { %1906 = vpow2.f32 %v1382_v33  ;;  %v1388_v43 = vmul.f32 1.442695, %v1369_v34  ;;  %v1234_v44 = vadd.f32 %v1211_v42, %v1112_v6  ;;  %v1368_v47 = vadd.f32 %v1609_v3, %v1353_v9  ;;  %v1857_v22 = vpop.f32.mrf.mxu0 }
 0x123   : > { %v1356_v40 = vadd.f32 %v1854_v31, %v1235_v26  ;;  %v1841_v49 = vpop.f32.mrf.mxu1  ;;  %vm1377_vm6 = vcmp.gt.f32.partialorder %v1369_v34, 0.0 }
 0x124   : > { %1908 = vpow2.f32 %v1388_v43  ;;  %v1355_v46 = vadd.f32 %v1332_v36, %v1234_v44  ;;  %v1237_v59 = vadd.f32 %v1841_v49, %v1115_v38  ;;  %v1386_v61 = vmul.f32 1.442695, %v1368_v47  ;;  %v1342_v48 = vpop.f32.mrf.mxu0 }
 0x125   : > { %v1371_v37 = vadd.f32 %v1609_v3, %v1356_v40  ;;  %v1221_v51 = vpop.f32.mrf.mxu1  ;;  %vm1376_vm7 = vcmp.gt.f32.partialorder %v1368_v47, 0.0 }
 0x126   : > { %v1370_v53 = vadd.f32 %v1609_v3, %v1355_v46  ;;  %v1358_v58 = vadd.f32 %v1857_v22, %v1237_v59  ;;  %v1236_v63 = vadd.f32 %v1221_v51, %v1114_v23  ;;  %1910 = vpow2.f32 %v1386_v61 }
 0x127   : > { %v1392_v45 = vmul.f32 1.442695, %v1371_v37  ;;  %vm1379_vm8 = vcmp.gt.f32.partialorder %v1371_v37, 0.0 }
 0x128   : > { %v1390_v11 = vmul.f32 1.442695, %v1370_v53  ;;  %v2396_v39 = vadd.f32 %v1609_v3, %v1358_v58  ;;  %v1357_v55 = vadd.f32 %v1342_v48, %v1236_v63  ;;  %vm1378_vm9 = vcmp.gt.f32.partialorder %v1370_v53, 0.0 }
 0x129   : > { %1912 = vpow2.f32 %v1392_v45 }
 0x12a   : > { %1914 = vpow2.f32 %v1390_v11  ;;  %v1396_v35 = vmul.f32 1.442695, %v2396_v39  ;;  %v2399_v60 = vadd.f32 %v1609_v3, %v1357_v55  ;;  %vm1381_vm10 = vcmp.gt.f32.partialorder %v2396_v39, 0.0 }
 0x12c   : > { %1916 = vpow2.f32 %v1396_v35  ;;  %v1394_v50 = vmul.f32 1.442695, %v2399_v60  ;;  %vm1380_vm11 = vcmp.gt.f32.partialorder %v2399_v60, 0.0 }
 0x12d   : > { %v1905_v52 = vpop.eup %1904 }
 0x12e   : > { %v1611_v14 = vadd.f32 -1.0, %v1905_v52  ;;  %1918 = vpow2.f32 %v1394_v50 }
 0x12f   : > { %v1907_v41 = vpop.eup %1906 }
 0x130   : > { %v1407_v57 = vmul.f32 1.6732632, %v1611_v14  ;;  %v1610_v1 = vadd.f32 -1.0, %v1907_v41 }
 0x131   : > { %v1909_v62 = vpop.eup %1908 }
 0x132   : > { %v1415_v16 = vsel %vm1375_vm3, %v2389_v17, %v1407_v57  ;;  %v1406_v3 = vmul.f32 1.6732632, %v1610_v1  ;;  %v1613_v54 = vadd.f32 -1.0, %v1909_v62 }
 0x133   : > { %v1423_v5 = vmul.f32 1.050701, %v1415_v16  ;;  %v1911_v12 = vpop.eup %1910 }
 0x134   : > { %v1414_v18 = vsel %vm1374_vm5, %v2393_v29, %v1406_v3  ;;  %v1409_v19 = vmul.f32 1.6732632, %v1613_v54  ;;  %v1612_v0 = vadd.f32 -1.0, %v1911_v12 }
 0x135   : > { %1432 = vst.msk [vmem:[%s2409_s6 + $0x8] sm:$0xff] %vm1430_vm4, %v1423_v5  ;;  %v1422_v56 = vmul.f32 1.050701, %v1414_v18 }
 0x136   : > { %v1913_v20 = vpop.eup %1912  ;;  %v1417_v8 = vsel %vm1377_vm6, %v1369_v34, %v1409_v19  ;;  %v1408_v4 = vmul.f32 1.6732632, %v1612_v0 }
 0x137   : > { %v1915_v17 = vpop.eup %1914  ;;  %1431 = vst.msk [vmem:[%s2409_s6] sm:$0xff] %vm1430_vm4, %v1422_v56  ;;  %v1425_v2 = vmul.f32 1.050701, %v1417_v8  ;;  %v1615_v10 = vadd.f32 -1.0, %v1913_v20 }
 0x138   : > { %v1614_v24 = vadd.f32 -1.0, %v1915_v17  ;;  %v1416_v25 = vsel %vm1376_vm7, %v1368_v47, %v1408_v4 }
 0x139   : > { %v1917_v13 = vpop.eup %1916  ;;  %1434 = vst.msk [vmem:[%s2409_s6 + $0x18] sm:$0xff] %vm1430_vm4, %v1425_v2  ;;  %v1411_v27 = vmul.f32 1.6732632, %v1615_v10  ;;  %v1424_v21 = vmul.f32 1.050701, %v1416_v25 }
 0x13a   : > { %v1410_v29 = vmul.f32 1.6732632, %v1614_v24  ;;  %v1617_v30 = vadd.f32 -1.0, %v1917_v13 }
 0x13b   : > { %v1919_v31 = vpop.eup %1918  ;;  %v1419_v32 = vsel %vm1379_vm8, %v1371_v37, %v1411_v27  ;;  %1433 = vst.msk [vmem:[%s2409_s6 + $0x10] sm:$0xff] %vm1430_vm4, %v1424_v21 }
 0x13c   : > { %v1427_v6 = vmul.f32 1.050701, %v1419_v32  ;;  %v1418_v15 = vsel %vm1378_vm9, %v1370_v53, %v1410_v29  ;;  %v1413_v7 = vmul.f32 1.6732632, %v1617_v30  ;;  %v1616_v28 = vadd.f32 -1.0, %v1919_v31 }
 0x13d   : > { %v1426_v33 = vmul.f32 1.050701, %v1418_v15 }
 0x13e   : > { %1436 = vst.msk [vmem:[%s2409_s6 + $0x28] sm:$0xff] %vm1430_vm4, %v1427_v6  ;;  %v1421_v34 = vsel %vm1381_vm10, %v2396_v39, %v1413_v7  ;;  %v1412_v36 = vmul.f32 1.6732632, %v1616_v28 }
 0x13f   : > { %1435 = vst.msk [vmem:[%s2409_s6 + $0x20] sm:$0xff] %vm1430_vm4, %v1426_v33  ;;  %v1429_v9 = vmul.f32 1.050701, %v1421_v34 }
 0x140   : > { %v1420_v26 = vsel %vm1380_vm11, %v2399_v60, %v1412_v36 }
 0x141   : > { %1438 = vst.msk [vmem:[%s2409_s6 + $0x38] sm:$0xff] %vm1430_vm4, %v1429_v9  ;;  %v1428_v42 = vmul.f32 1.050701, %v1420_v26 }
 0x143   : > { %1437 = vst.msk [vmem:[%s2409_s6 + $0x30] sm:$0xff] %vm1430_vm4, %v1428_v42 }
 0x144   : > { %1933 = shalt.err (!%p1930_p3)
}
 0x145   : > { %s1934_s25 = scalar_lea.hbm %s2432_s17, 1024  ;;  %s1938_s28 = scalar_lea.hbm %s2485_s3, 2048 }
 0x146   : > { %p1935_p4 = scmp.ne.s32.totalorder %s2432_s17, %s1934_s25  ;;  %p1939_p9 = scmp.lt.s32.totalorder %s2432_s17, %s2485_s3 }
 0x147   : > { %p1940_p10 = scmp.lt.s32.totalorder %s1938_s28, %s1934_s25 }
 0x148   : > { %p1936_p7 = pnand %p1935_p4, %p2043_p5 }
 0x149   : > { %p1941_p11 = por %p1940_p10, %p1939_p9 }
 0x14a   : > { %p1937_p8 = pneg %p1936_p7 }
 0x14c   : > { %p1942_p12 = pnand %p1941_p11, %p1937_p8 }
 0x14e   : > { %1945 = shalt.err (!%p1942_p12)
}
 0x14f   : > { %s1983_s4 = smov 128   ;;  %s1984_s5 = smov 8  }
 0x150   : > { %1863 = dma.vmem_to_hbm [thread:$0]  (%p2043_p5), %s2434_s8, 1024, %s2432_s17, %s2442_s16, %s1983_s4, %s1983_s4, %s1984_s5  }
 0x151 PF: > { %p1869_p13 = scmp.ge.s32.totalorder %s1980_s15, 2  ;;  %s1468_s6 = sand.u32 1, %s1968_s12  }
 0x152   : > { %s1469_s7 = scalar_lea.sflag [#allocation3], %s1468_s6 }
 0x153   : > { %p1866_p0 = pnand %p1869_p13, %p2047_p6 }
 0x155   : > { %p1867_p1 = pneg %p1866_p0 }
 0x157   : > { %1963 = dma.done.wait (%p1867_p1), %s1469_s7, 1024  }
 0x158   : > { %1965 = vsyncadd (%p1867_p1), %s1469_s7, 4294966272  ;;  %p13_p2 = scmp.ge.s32.totalorder %s2030_s18, 4   ;;  %s2488_s12 = smov %s1972_s13 }
 0x159   : > { %s2489_s13 = smov %s1976_s14  ;;  %s2490_s14 = smov %s2041_s21 }
 0x15a   : > { %s2491_s15 = smov %s2030_s18  ;;  %15 = sbr.rel (!%p13_p2) target bundleno = 3 (0x3), region = 75 }
 0x15f   :  { %1474 = vsyncpa [#allocation3], 1 }
 0x160   :  { %1476 = vsyncpa [#allocation3 + $0x1], 1 }

</bundles_post_ra>
